<compile_context>
chip_gen: v7x
topology: tpu7x:2x2x1
jax: 0.10.0
libtpu: 0.0.40
codegen_flags: <defaults>
</compile_context>

<pallas_src>
import jax
import jax.numpy as jnp
from jax.experimental import pallas as pl
from jax.experimental.pallas import tpu as pltpu


def _round_up(x, m):
    return ((x + m - 1) // m) * m


def _cdiv(a, b):
    return (a + b - 1) // b


# -----------------------------------------------------------------------------
# Kernels
# -----------------------------------------------------------------------------
def _ffn_kernel_single(x_ref, w1_ref, b1_ref, w2_ref, b2_ref, o_ref):
    """Fast path: whole d_ff resident in VMEM, single pass, no accumulator RMW."""
    x = x_ref[...].astype(w1_ref.dtype)                       # f32 -> bf16, once per tile
    h = jnp.dot(x, w1_ref[...], preferred_element_type=jnp.float32)
    h = jnp.maximum(h + b1_ref[...], 0.0)                     # bias + ReLU in f32
    # dropout: identity (eval mode)
    acc = jnp.dot(h.astype(w2_ref.dtype), w2_ref[...],
                  preferred_element_type=jnp.float32)
    o_ref[...] = (acc + b2_ref[...]).astype(o_ref.dtype)


def _ffn_kernel_ktiled(x_ref, w1_ref, b1_ref, w2_ref, b2_ref, o_ref,
                       acc_ref, xbf_ref):
    """K-tiled path: grid = (M tiles [parallel], d_ff slabs [arbitrary, last])."""
    k = pl.program_id(1)

    @pl.when(k == 0)
    def _init():
        acc_ref[...] = jnp.zeros_like(acc_ref)
        xbf_ref[...] = x_ref[...].astype(xbf_ref.dtype)        # cast once per M tile

    # (tm, d_model) @ (d_model, tk) slab; bias+ReLU exact per d_ff slice.
    h = jnp.dot(xbf_ref[...], w1_ref[...], preferred_element_type=jnp.float32)
    h = jnp.maximum(h + b1_ref[...], 0.0)
    # dropout: identity (eval mode)
    acc_ref[...] += jnp.dot(h.astype(w2_ref.dtype), w2_ref[...],
                            preferred_element_type=jnp.float32)

    @pl.when(k == pl.num_programs(1) - 1)
    def _finalize():
        o_ref[...] = (acc_ref[...] + b2_ref[...]).astype(o_ref.dtype)


# -----------------------------------------------------------------------------
# Configuration helpers (trace-time, static)
# -----------------------------------------------------------------------------
def _tpu_kind():
    try:
        return jax.devices()[0].device_kind.lower()
    except Exception:
        return ""


def _generation_defaults():
    kind = _tpu_kind()
    if "7" in kind:      # v7x: 64 MiB VMEM/TC, 2 TCs/chip
        return dict(tm=512, tk=512, vmem=52 << 20, two_cores=True)
    if "v6" in kind:     # v6e: 128 MiB VMEM, needs ~574 FLOP/B to be MXU-bound
        return dict(tm=1024, tk=1024, vmem=100 << 20, two_cores=False)
    if "v5" in kind:     # v5e/v5p: 128 MiB VMEM, ~240 FLOP/B knee
        return dict(tm=512, tk=1024, vmem=64 << 20, two_cores=False)
    # Unknown: safe on the smallest-VMEM generation (v7x, 64 MiB physical).
    return dict(tm=512, tk=512, vmem=48 << 20, two_cores=False)


def _vmem_single_bytes(tm, d_model_p, d_ff_p):
    x_buf = 2 * tm * d_model_p * 4                 # f32 input tile, double-buffered
    w = 2 * 2 * d_model_p * d_ff_p * 2             # W1 + W2 bf16, double-buffered
    out = 2 * tm * d_model_p * 4                   # f32 output tile, double-buffered
    h_tmp = tm * d_ff_p * (4 + 2)                  # f32 h + bf16 cast temp
    bias = 2 * (d_ff_p + d_model_p) * 4
    return x_buf + w + out + h_tmp + bias


def _vmem_ktiled_bytes(tm, tk, d_model_p):
    x_buf = 2 * tm * d_model_p * 4
    xbf = tm * d_model_p * 2                       # bf16 x cache scratch
    w = 2 * 2 * d_model_p * tk * 2                 # W1/W2 K-slabs, double-buffered
    out = 2 * tm * d_model_p * 4
    acc = tm * d_model_p * 4                       # f32 accumulator scratch
    h_tmp = tm * tk * (4 + 2)
    bias = 2 * (tk + d_model_p) * 4
    return x_buf + xbf + w + out + acc + h_tmp + bias


def _pick_divisor_tile(n, target):
    """Largest multiple of 128 that divides n and is <= max(target, 128)."""
    target = max(target, 128)
    best, t = 128, 128
    while t <= min(target, n):
        if n % t == 0:
            best = t
        t += 128
    return best


# -----------------------------------------------------------------------------
# Public API
# -----------------------------------------------------------------------------
def prepare_ffn_params(w1, b1, w2, b2):
    """One-time (outside the hot path) 128-padding + bf16 cast of the weights."""
    d_model, d_ff = w1.shape
    d_model_p = _round_up(d_model, 128)
    d_ff_p = _round_up(d_ff, 128)
    cdt = jnp.bfloat16
    b1 = jnp.asarray(b1).reshape(1, d_ff)
    b2 = jnp.asarray(b2).reshape(1, d_model)
    if (d_model_p, d_ff_p) == (d_model, d_ff):
        # Already aligned (common case): cast only, no padding copies.
        return (w1.astype(cdt), b1.astype(jnp.float32),
                w2.astype(cdt), b2.astype(jnp.float32))
    w1_p = jnp.zeros((d_model_p, d_ff_p), cdt).at[:d_model, :d_ff].set(w1.astype(cdt))
    b1_p = jnp.zeros((1, d_ff_p), jnp.float32).at[:, :d_ff].set(b1.astype(jnp.float32))
    w2_p = jnp.zeros((d_ff_p, d_model_p), cdt).at[:d_ff, :d_model].set(w2.astype(cdt))
    b2_p = jnp.zeros((1, d_model_p), jnp.float32).at[:, :d_model].set(b2.astype(jnp.float32))
    return (w1_p, b1_p, w2_p, b2_p)


def feed_forward(x, params, *, tm=None, tk=None):
    """x: (B, S, d_model) f32 -> (B, S, d_model) f32.  params: prepare_ffn_params output."""
    w1_p, b1_p, w2_p, b2_p = params
    B, S, d_model = x.shape
    d_model_p, d_ff_p = w1_p.shape
    M = B * S

    cfg = _generation_defaults()
    tm = _round_up(tm, 128) if tm else cfg["tm"]       # clamp user hints to 128-multiples
    tk = _round_up(tk, 128) if tk else cfg["tk"]
    vmem_budget = cfg["vmem"]

    M128 = _round_up(M, 128)
    tm = min(tm, M128)
    # v7x megacore: make sure the parallel axis has >= 2 tiles when possible.
    if cfg["two_cores"] and M128 >= 256 and _cdiv(M128, tm) < 2:
        tm = _round_up(_cdiv(M128, 2), 128)
    tk = _pick_divisor_tile(d_ff_p, min(tk, d_ff_p))

    # Single-shot fast path if the whole (padded) weight pair fits the budget.
    single = _vmem_single_bytes(tm, d_model_p, d_ff_p) <= vmem_budget
    if not single:
        while _vmem_ktiled_bytes(tm, tk, d_model_p) > vmem_budget and tk > 128:
            tk = _pick_divisor_tile(d_ff_p, tk - 128)
        while _vmem_ktiled_bytes(tm, tk, d_model_p) > vmem_budget and tm > 128:
            tm -= 128

    M_p = _round_up(M, tm)

    # x stays f32; pad only when geometry requires it (zero-copy reshape otherwise).
    x2d = x.reshape(M, d_model)
    if (M_p, d_model_p) != (M, d_model):
        x2d = jnp.zeros((M_p, d_model_p), x.dtype).at[:M, :d_model].set(x2d)

    out_dtype = x.dtype  # keep f32 output to match the PyTorch module

    if single:
        out2d = pl.pallas_call(
            _ffn_kernel_single,
            out_shape=jax.ShapeDtypeStruct((M_p, d_model_p), out_dtype),
            grid_spec=pltpu.PrefetchScalarGridSpec(
                num_scalar_prefetch=0,
                grid=(M_p // tm,),
                in_specs=[
                    pl.BlockSpec((tm, d_model_p), lambda i: (i, 0)),      # x tile
                    pl.BlockSpec((d_model_p, d_ff_p), lambda i: (0, 0)),  # W1 (resident)
                    pl.BlockSpec((1, d_ff_p), lambda i: (0, 0)),          # b1
                    pl.BlockSpec((d_ff_p, d_model_p), lambda i: (0, 0)),  # W2 (resident)
                    pl.BlockSpec((1, d_model_p), lambda i: (0, 0)),       # b2
                ],
                out_specs=pl.BlockSpec((tm, d_model_p), lambda i: (i, 0)),
            ),
            compiler_params=pltpu.CompilerParams(
                dimension_semantics=("parallel",),
                vmem_limit_bytes=vmem_budget,
            ),
        )(x2d, w1_p, b1_p, w2_p, b2_p)
    else:
        grid = (M_p // tm, d_ff_p // tk)  # M parallel, d_ff reduction last
        out2d = pl.pallas_call(
            _ffn_kernel_ktiled,
            out_shape=jax.ShapeDtypeStruct((M_p, d_model_p), out_dtype),
            grid_spec=pltpu.PrefetchScalarGridSpec(
                num_scalar_prefetch=0,
                grid=grid,
                in_specs=[
                    pl.BlockSpec((tm, d_model_p), lambda i, k: (i, 0)),   # x tile (const over k)
                    pl.BlockSpec((d_model_p, tk), lambda i, k: (0, k)),   # W1 K-slab
                    pl.BlockSpec((1, tk), lambda i, k: (0, k)),           # b1 K-slab
                    pl.BlockSpec((tk, d_model_p), lambda i, k: (k, 0)),   # W2 K-slab
                    pl.BlockSpec((1, d_model_p), lambda i, k: (0, 0)),    # b2
                ],
                out_specs=pl.BlockSpec((tm, d_model_p), lambda i, k: (i, 0)),
                scratch_shapes=[
                    pltpu.VMEM((tm, d_model_p), jnp.float32),    # f32 accumulator
                    pltpu.VMEM((tm, d_model_p), jnp.bfloat16),   # bf16 x cache
                ],
            ),
            compiler_params=pltpu.CompilerParams(
                dimension_semantics=("parallel", "arbitrary"),
                vmem_limit_bytes=vmem_budget,
            ),
        )(x2d, w1_p, b1_p, w2_p, b2_p)

    return out2d[:M, :d_model].reshape(B, S, d_model)


def init_params(key, d_model, d_ff):
    """Deterministic nn.Linear-style init (uniform(-1/sqrt(fan_in), 1/sqrt(fan_in)))."""
    k1, k2, k3, k4 = jax.random.split(key, 4)
    bound1 = 1.0 / (d_model ** 0.5)
    bound2 = 1.0 / (d_ff ** 0.5)
    w1 = jax.random.uniform(k1, (d_model, d_ff), jnp.float32, -bound1, bound1)
    b1 = jax.random.uniform(k2, (1, d_ff), jnp.float32, -bound1, bound1)
    w2 = jax.random.uniform(k3, (d_ff, d_model), jnp.float32, -bound2, bound2)
    b2 = jax.random.uniform(k4, (1, d_model), jnp.float32, -bound2, bound2)
    return w1, b1, w2, b2


if __name__ == "__main__":
    key = jax.random.PRNGKey(0)
    kx, kp = jax.random.split(key)

    batch, seq, d_model, d_ff = 2, 8, 32, 64
    x = jax.random.normal(kx, (batch, seq, d_model), jnp.float32)
    w1, b1, w2, b2 = init_params(kp, d_model, d_ff)

    # Weights prepared once, outside the hot path.
    params = prepare_ffn_params(w1, b1, w2, b2)
    params = jax.tree_util.tree_map(jax.block_until_ready, params)

    out = feed_forward(x, params)
    out = jax.block_until_ready(out)

    # Reference check (plain JAX, f32); tolerance covers the bf16 MXU path.
    ref = jnp.maximum(x @ w1 + b1[0], 0.0) @ w2 + b2[0]
    assert out.shape == (batch, seq, d_model)
    assert jnp.allclose(out, ref, atol=3e-2, rtol=3e-2), float(
        jnp.max(jnp.abs(out - ref)))

    print("KERNEL_OK")
</pallas_src>

<mosaic_0001>
module attributes {stable_mosaic.version = 11 : i64} {
  func.func @_ffn_kernel_single(%arg0: i32, %arg1: memref<128x128xf32, #tpu.memory_space<vmem>>, %arg2: memref<128x128xbf16, #tpu.memory_space<vmem>>, %arg3: memref<1x128xf32, #tpu.memory_space<vmem>>, %arg4: memref<128x128xbf16, #tpu.memory_space<vmem>>, %arg5: memref<1x128xf32, #tpu.memory_space<vmem>>, %arg6: memref<128x128xf32, #tpu.memory_space<vmem>>) attributes {dimension_semantics = [#tpu.dimension_semantics<parallel>], iteration_bounds = array<i64: 1>, scalar_prefetch = 0 : i64, scratch_operands = 0 : i64, tpu.core_type = #tpu.core_type<tc>, window_params = [{transform_indices = @transform_0, window_bounds = array<i64: 128, 128>}, {pipeline_mode = #tpu.pipeline_mode<synchronous>, transform_indices = @transform_1, window_bounds = array<i64: 128, 128>}, {pipeline_mode = #tpu.pipeline_mode<synchronous>, transform_indices = @transform_2, window_bounds = array<i64: 1, 128>}, {pipeline_mode = #tpu.pipeline_mode<synchronous>, transform_indices = @transform_3, window_bounds = array<i64: 128, 128>}, {pipeline_mode = #tpu.pipeline_mode<synchronous>, transform_indices = @transform_4, window_bounds = array<i64: 1, 128>}, {transform_indices = @transform_5, window_bounds = array<i64: 128, 128>}]} {
    %c0 = arith.constant 0 : index
    %c0_0 = arith.constant 0 : index
    %0 = vector.load %arg1[%c0, %c0_0] : memref<128x128xf32, #tpu.memory_space<vmem>>, vector<128x128xf32>
    %1 = arith.truncf %0 : vector<128x128xf32> to vector<128x128xbf16>
    %c0_1 = arith.constant 0 : index
    %c0_2 = arith.constant 0 : index
    %2 = vector.load %arg2[%c0_1, %c0_2] : memref<128x128xbf16, #tpu.memory_space<vmem>>, vector<128x128xbf16>
    %cst = arith.constant dense<0.000000e+00> : vector<128x128xf32>
    %3 = tpu.matmul %1, %2, %cst {dimension_numbers = #tpu.dot_dimension_numbers<[1], [0], [0], [1], [0, 0, 1, 1], [], []>} : vector<128x128xbf16>, vector<128x128xbf16>, vector<128x128xf32> -> vector<128x128xf32>
    %c0_3 = arith.constant 0 : index
    %c0_4 = arith.constant 0 : index
    %4 = vector.load %arg3[%c0_3, %c0_4] : memref<1x128xf32, #tpu.memory_space<vmem>>, vector<1x128xf32>
    %5 = vector.broadcast %4 : vector<1x128xf32> to vector<128x128xf32>
    %6 = arith.addf %3, %5 : vector<128x128xf32>
    %cst_5 = arith.constant 0.000000e+00 : f32
    %7 = vector.broadcast %cst_5 : f32 to vector<128x128xf32>
    %8 = arith.maximumf %6, %7 : vector<128x128xf32>
    %9 = arith.truncf %8 : vector<128x128xf32> to vector<128x128xbf16>
    %c0_6 = arith.constant 0 : index
    %c0_7 = arith.constant 0 : index
    %10 = vector.load %arg4[%c0_6, %c0_7] : memref<128x128xbf16, #tpu.memory_space<vmem>>, vector<128x128xbf16>
    %cst_8 = arith.constant dense<0.000000e+00> : vector<128x128xf32>
    %11 = tpu.matmul %9, %10, %cst_8 {dimension_numbers = #tpu.dot_dimension_numbers<[1], [0], [0], [1], [0, 0, 1, 1], [], []>} : vector<128x128xbf16>, vector<128x128xbf16>, vector<128x128xf32> -> vector<128x128xf32>
    %c0_9 = arith.constant 0 : index
    %c0_10 = arith.constant 0 : index
    %12 = vector.load %arg5[%c0_9, %c0_10] : memref<1x128xf32, #tpu.memory_space<vmem>>, vector<1x128xf32>
    %13 = vector.broadcast %12 : vector<1x128xf32> to vector<128x128xf32>
    %14 = arith.addf %11, %13 : vector<128x128xf32>
    %c0_11 = arith.constant 0 : index
    %c0_12 = arith.constant 0 : index
    %15 = vector.load %arg6[%c0_11, %c0_12] : memref<128x128xf32, #tpu.memory_space<vmem>>, vector<128x128xf32>
    tpu.vector_store %arg6[%c0_11, %c0_12], %14 {strides = array<i32>} : memref<128x128xf32, #tpu.memory_space<vmem>>, vector<128x128xf32>,
    return
  }
  func.func @transform_0(%arg0: i32) -> (i32, i32) {
    %c0_i32 = arith.constant 0 : i32
    %c0_i32_0 = arith.constant 0 : i32
    return %arg0, %c0_i32 : i32, i32
  }
  func.func @transform_1(%arg0: i32) -> (i32, i32) {
    %c0_i32 = arith.constant 0 : i32
    %c0_i32_0 = arith.constant 0 : i32
    %c0_i32_1 = arith.constant 0 : i32
    return %c0_i32, %c0_i32_0 : i32, i32
  }
  func.func @transform_2(%arg0: i32) -> (i32, i32) {
    %c0_i32 = arith.constant 0 : i32
    %c0_i32_0 = arith.constant 0 : i32
    %c0_i32_1 = arith.constant 0 : i32
    return %c0_i32, %c0_i32_0 : i32, i32
  }
  func.func @transform_3(%arg0: i32) -> (i32, i32) {
    %c0_i32 = arith.constant 0 : i32
    %c0_i32_0 = arith.constant 0 : i32
    %c0_i32_1 = arith.constant 0 : i32
    return %c0_i32, %c0_i32_0 : i32, i32
  }
  func.func @transform_4(%arg0: i32) -> (i32, i32) {
    %c0_i32 = arith.constant 0 : i32
    %c0_i32_0 = arith.constant 0 : i32
    %c0_i32_1 = arith.constant 0 : i32
    return %c0_i32, %c0_i32_0 : i32, i32
  }
  func.func @transform_5(%arg0: i32) -> (i32, i32) {
    %c0_i32 = arith.constant 0 : i32
    %c0_i32_0 = arith.constant 0 : i32
    return %arg0, %c0_i32 : i32, i32
  }
}

</mosaic_0001>

<bundles_post_ra>
// kernel: tpu_custom_call.1
= control target key start
LH: loop header
LB: loop body
LE: loop exit
PB: predicated region body
PF: predicated region fallthrough
CT: control target
= control target key end

     0   :  { %10 = vsyncpa [#allocation3], 0  ;;  %s817_s0 = inlined_call_operand.hbm [shape: f32[128,128], index: 0, kind: input, shape index: {}]   ;;  %s818_s1 = inlined_call_operand.hbm [shape: bf16[128,128], index: 1, kind: input, shape index: {}]   ;;  %s819_s2 = inlined_call_operand.vmem [shape: f32[1,128], index: 2, kind: input, shape index: {}]   ;;  %s820_s3 = inlined_call_operand.hbm [shape: bf16[128,128], index: 3, kind: input, shape index: {}]   ;;  %s821_s4 = inlined_call_operand.vmem [shape: f32[1,128], index: 4, kind: input, shape index: {}]   ;;  %s822_s5 = inlined_call_operand.hbm [shape: f32[128,128], index: 5, kind: output, shape index: {}]  }
   0x1   :  { %11 = vsyncpa [#allocation6], 0 }
   0x2   :  { %12 = vsyncpa [#allocation4], 0  ;;  %s713_s18 = smov [#allocation5]   ;;  %s619_s22 = scalar_lea.hbm %s818_s1, 1024 }
   0x3   :  { %s30_s19 = sshll.u32 %s713_s18, 4  ;;  %p620_p0 = scmp.ne.s32.totalorder %s818_s1, %s619_s22  ;;  %s31_s19 = int_to_ptr.vmem [resolvable:$true] %s30_s19 }
   0x4   :  { %p623_p1 = scmp.lt.u32.totalorder %s619_s22, %s818_s1 }
   0x6   :  { %p625_p2 = pnand %p623_p1, %p620_p0 }
   0x8   :  { %628 = shalt.err (!%p625_p2)
}
   0x9   :  { %s629_s27 = scalar_lea.vmem %s31_s19, 1024  ;;  %p634_p4 = scmp.lt.s32.totalorder %s31_s19, %s31_s19 }
   0xa   :  { %p630_p3 = scmp.ne.s32.totalorder %s31_s19, %s629_s27  ;;  %p635_p5 = scmp.lt.s32.totalorder %s629_s27, %s629_s27 }
   0xc   :  { %p636_p6 = por %p635_p5, %p634_p4 }
   0xe   :  { %p637_p7 = pnand %p636_p6, %p630_p3 }
  0x10   :  { %640 = shalt.err (!%p637_p7)
}
  0x11   :  { %s714_s28 = smov 64   ;;  %s715_s29 = smov 4  }
  0x12   :  { %36 = dma.hbm_to_vmem [thread:$0]  %s818_s1, 1024, %s31_s19, [#allocation6], %s714_s28, %s714_s28, %s715_s29  }
  0x13   :  { %s716_s7 = smov [#allocation2]   ;;  %s641_s11 = scalar_lea.hbm %s817_s0, 2048 }
  0x14   :  { %s18_s8 = sshll.u32 %s716_s7, 4  ;;  %p642_p8 = scmp.ne.s32.totalorder %s817_s0, %s641_s11  ;;  %s19_s8 = int_to_ptr.vmem [resolvable:$true] %s18_s8 }
  0x15   :  { %p645_p9 = scmp.lt.u32.totalorder %s641_s11, %s817_s0 }
  0x17   :  { %p647_p10 = pnand %p645_p9, %p642_p8 }
  0x19   :  { %650 = shalt.err (!%p647_p10)
}
  0x1a   :  { %s651_s16 = scalar_lea.vmem %s19_s8, 2048  ;;  %p656_p12 = scmp.lt.s32.totalorder %s19_s8, %s19_s8 }
  0x1b   :  { %p652_p11 = scmp.ne.s32.totalorder %s19_s8, %s651_s16  ;;  %p657_p13 = scmp.lt.s32.totalorder %s651_s16, %s651_s16 }
  0x1d   :  { %p658_p0 = por %p657_p13, %p656_p12 }
  0x1f   :  { %p659_p1 = pnand %p658_p0, %p652_p11 }
  0x21   :  { %662 = shalt.err (!%p659_p1)
}
  0x22   :  { %s717_s1 = smov 128   ;;  %s718_s17 = smov 8  }
  0x23   :  { %24 = dma.hbm_to_vmem [thread:$0]  %s817_s0, 2048, %s19_s8, [#allocation3], %s717_s1, %s717_s1, %s718_s17  }
  0x24   :  { %s719_s20 = smov [#allocation7]   ;;  %s663_s24 = scalar_lea.hbm %s820_s3, 1024 }
  0x25   :  { %s44_s21 = sshll.u32 %s719_s20, 4  ;;  %p664_p2 = scmp.ne.s32.totalorder %s820_s3, %s663_s24  ;;  %s45_s21 = int_to_ptr.vmem [resolvable:$true] %s44_s21 }
  0x26   :  { %p667_p3 = scmp.lt.u32.totalorder %s663_s24, %s820_s3 }
  0x28   :  { %p669_p4 = pnand %p667_p3, %p664_p2 }
  0x2a   :  { %672 = shalt.err (!%p669_p4)
}
  0x2b   :  { %s673_s6 = scalar_lea.vmem %s45_s21, 1024  ;;  %p678_p6 = scmp.lt.s32.totalorder %s45_s21, %s45_s21 }
  0x2c   :  { %p674_p5 = scmp.ne.s32.totalorder %s45_s21, %s673_s6  ;;  %p679_p7 = scmp.lt.s32.totalorder %s673_s6, %s673_s6 }
  0x2e   :  { %p680_p8 = por %p679_p7, %p678_p6 }
  0x30   :  { %p681_p9 = pnand %p680_p8, %p674_p5 }
  0x32   :  { %684 = shalt.err (!%p681_p9)
}
  0x33   :  { %50 = dma.hbm_to_vmem [thread:$0]  %s820_s3, 1024, %s45_s21, [#allocation6], %s714_s28, %s714_s28, %s715_s29  }
  0x34   :  { %707 = dma.done.wait [#allocation3], 2048  }
  0x35   :  { %708 = vsyncadd [#allocation3], 4294965248 }
  0x36   :  { %709 = dma.done.wait [#allocation6], 2048  }
  0x37   :  { %710 = vsyncadd [#allocation6], 4294965248  ;;  %v603_v0 = vld [vmem:[#allocation5] sm:$0xff]   ;;  %v604_v1 = vld [vmem:[#allocation5 + $0x8] sm:$0xff]  }
  0x38   :  { %531 = vmatprep.subr.bf16.mxu0 %v603_v0  ;;  %v605_v2 = vld [vmem:[#allocation5 + $0x10] sm:$0xff]   ;;  %v606_v3 = vld [vmem:[#allocation5 + $0x18] sm:$0xff]   ;;  %v63_v4 = vld [vmem:[#allocation2] sm:$0xff] }
  0x39   :  { %532 = vmatpush3.bf16.msra.mxu0 %v603_v0  ;;  %v64_v5 = vld [vmem:[#allocation2 + $0x8] sm:$0xff]  ;;  %v607_v7 = vld [vmem:[#allocation5 + $0x20] sm:$0xff]   ;;  %v613_v11 = vld [vmem:[#allocation7 + $0x10] sm:$0xff]  }
  0x3a   :  { %533 = vmatprep.subr.bf16.mxu0 %v604_v1  ;;  %v79_v6 = vpack.c.bf16 %v64_v5, %v63_v4  ;;  %v611_v8 = vld [vmem:[#allocation7] sm:$0xff]   ;;  %v612_v9 = vld [vmem:[#allocation7 + $0x8] sm:$0xff]   ;;  %v609_v12 = vld [vmem:[#allocation5 + $0x30] sm:$0xff]  }
  0x3b   :  { %v608_v10 = vld [vmem:[#allocation5 + $0x28] sm:$0xff]   ;;  %563 = vmatprep.subr.bf16.mxu1 %v611_v8  ;;  %v614_v13 = vld [vmem:[#allocation7 + $0x18] sm:$0xff]   ;;  %v615_v15 = vld [vmem:[#allocation7 + $0x20] sm:$0xff]  }
  0x3c   :  { %547 = vmatprep.mubr.bf16.mxu0 %v79_v6  ;;  %564 = vmatpush3.bf16.msra.mxu1 %v611_v8  ;;  %v610_v14 = vld [vmem:[#allocation5 + $0x38] sm:$0xff]   ;;  %v65_v16 = vld [vmem:[#allocation2 + $0x10] sm:$0xff]  ;;  %v67_v18 = vld [vmem:[#allocation2 + $0x20] sm:$0xff] }
  0x3d   :  { %534 = vmatpush3.bf16.msra.mxu0 %v604_v1  ;;  %565 = vmatprep.subr.bf16.mxu1 %v612_v9  ;;  %v66_v17 = vld [vmem:[#allocation2 + $0x18] sm:$0xff]  ;;  %v68_v19 = vld [vmem:[#allocation2 + $0x28] sm:$0xff]  ;;  %v69_v23 = vld [vmem:[#allocation2 + $0x30] sm:$0xff] }
  0x3e   :  { %535 = vmatprep.subr.bf16.mxu0 %v605_v2  ;;  %v80_v20 = vpack.c.bf16 %v66_v17, %v65_v16  ;;  %v616_v21 = vld [vmem:[#allocation7 + $0x28] sm:$0xff]   ;;  %v81_v22 = vpack.c.bf16 %v68_v19, %v67_v18  ;;  %v70_v24 = vld [vmem:[#allocation2 + $0x38] sm:$0xff]  ;;  %v71_v25 = vld [vmem:[#allocation2 + $0x40] sm:$0xff] }
  0x3f   :  { %v72_v26 = vld [vmem:[#allocation2 + $0x48] sm:$0xff]  ;;  %v82_v27 = vpack.c.bf16 %v70_v24, %v69_v23  ;;  %v73_v29 = vld [vmem:[#allocation2 + $0x50] sm:$0xff]  ;;  %v74_v30 = vld [vmem:[#allocation2 + $0x58] sm:$0xff] }
  0x40   :  { %566 = vmatpush3.bf16.msra.mxu1 %v612_v9  ;;  %v83_v28 = vpack.c.bf16 %v72_v26, %v71_v25  ;;  %v75_v31 = vld [vmem:[#allocation2 + $0x60] sm:$0xff]  ;;  %v76_v32 = vld [vmem:[#allocation2 + $0x68] sm:$0xff]  ;;  %v84_v33 = vpack.c.bf16 %v74_v30, %v73_v29  ;;  %v77_v35 = vld [vmem:[#allocation2 + $0x70] sm:$0xff] }
  0x41   :  { %536 = vmatpush3.bf16.msra.mxu0 %v605_v2  ;;  %567 = vmatprep.subr.bf16.mxu1 %v613_v11  ;;  %v85_v34 = vpack.c.bf16 %v76_v32, %v75_v31  ;;  %v78_v36 = vld [vmem:[#allocation2 + $0x78] sm:$0xff]  ;;  %v617_v38 = vld [vmem:[#allocation7 + $0x30] sm:$0xff]   ;;  %v481_v40 = vld [vmem:[%s819_s2] ss:$0 sm:$0xff] }
  0x42   :  { %537 = vmatprep.subr.bf16.mxu0 %v606_v3  ;;  %v86_v37 = vpack.c.bf16 %v78_v36, %v77_v35  ;;  %v618_v39 = vld [vmem:[#allocation7 + $0x38] sm:$0xff]  }
  0x44   :  { %568 = vmatpush3.bf16.msra.mxu1 %v613_v11 }
  0x45   :  { %538 = vmatpush3.bf16.msra.mxu0 %v606_v3  ;;  %569 = vmatprep.subr.bf16.mxu1 %v614_v13 }
  0x46   :  { %539 = vmatprep.subr.bf16.mxu0 %v607_v7 }
  0x48   :  { %570 = vmatpush3.bf16.msra.mxu1 %v614_v13 }
  0x49   :  { %540 = vmatpush3.bf16.msra.mxu0 %v607_v7  ;;  %571 = vmatprep.subr.bf16.mxu1 %v615_v15 }
  0x4a   :  { %541 = vmatprep.subr.bf16.mxu0 %v608_v10 }
  0x4c   :  { %572 = vmatpush3.bf16.msra.mxu1 %v615_v15 }
  0x4d   :  { %542 = vmatpush3.bf16.msra.mxu0 %v608_v10  ;;  %573 = vmatprep.subr.bf16.mxu1 %v616_v21 }
  0x4e   :  { %543 = vmatprep.subr.bf16.mxu0 %v609_v12 }
  0x50   :  { %574 = vmatpush3.bf16.msra.mxu1 %v616_v21 }
  0x51   :  { %544 = vmatpush3.bf16.msra.mxu0 %v609_v12  ;;  %575 = vmatprep.subr.bf16.mxu1 %v617_v38 }
  0x52   :  { %545 = vmatprep.subr.bf16.mxu0 %v610_v14 }
  0x54   :  { %576 = vmatpush3.bf16.msra.mxu1 %v617_v38 }
  0x55   :  { %546 = vmatpush3.bf16.msra.mxu0 %v610_v14  ;;  %577 = vmatprep.subr.bf16.mxu1 %v618_v39 }
  0x58   :  { %548 = vmatmul.mubr.bf16.vlgmr.msra.gmra.mrb[0].mxu0 %v80_v20  ;;  %578 = vmatpush3.bf16.msra.mxu1 %v618_v39 }
  0x59   :  { %551 = vmatprep.mubr.bf16.mxu0 %v81_v22 }
  0x60   :  { %552 = vmatmul.mubr.bf16.gmra.mrb[4].mxu0 %v82_v27 }
  0x61   :  { %555 = vmatprep.mubr.bf16.mxu0 %v83_v28 }
  0x68   :  { %556 = vmatmul.mubr.bf16.gmra.mrb[8].mxu0 %v84_v33  ;;  %v490_v33 = vld [vmem:[%s821_s4] ss:$0 sm:$0xff]  ;;  %s720_s4 = smov [#allocation8]  }
  0x69   :  { %559 = vmatprep.mubr.bf16.mxu0 %v85_v34  ;;  %s468_s8 = sshll.u32 %s720_s4, 4  ;;  %s469_s8 = int_to_ptr.vmem [resolvable:$true] %s468_s8 }
  0x6a   :  { %s685_s9 = scalar_lea.vmem %s469_s8, 2048  ;;  %p690_p11 = scmp.lt.s32.totalorder %s469_s8, %s469_s8 }
  0x6b   :  { %p686_p10 = scmp.ne.s32.totalorder %s469_s8, %s685_s9  ;;  %p691_p12 = scmp.lt.s32.totalorder %s685_s9, %s685_s9 }
  0x6d   :  { %p692_p13 = por %p691_p12, %p690_p11 }
  0x6f   :  { %p693_p0 = pnand %p692_p13, %p686_p10 }
  0x70   :  { %560 = vmatmul.mubr.bf16.gmra.mrb[12].mxu0 %v86_v37 }
 0x12b   :  { %v549_v41 = vpop.f32.mrb[0].mxu0 }
 0x12c   :  { %v201_v42 = vadd.f32 %v549_v41, %v481_v40  ;;  %v192_v43 = vpop.f32.mrb[1].mxu0 }
 0x12d   :  { %v193_v44 = vadd.f32 %v481_v40, %v192_v43  ;;  %v550_v45 = vpop.f32.mrb[2].mxu0 }
 0x12e   :  { %v204_v46 = vadd.f32 %v550_v45, %v481_v40  ;;  %v195_v47 = vpop.f32.mrb[3].mxu0  ;;  %v257_v49 = vmax.f32 %v201_v42, 0.0 }
 0x12f   :  { %v196_v48 = vadd.f32 %v481_v40, %v195_v47  ;;  %v255_v51 = vmax.f32 %v193_v44, 0.0 }
 0x130   :  { %v258_v50 = vmax.f32 %v204_v46, 0.0 }
 0x131   :  { %v256_v52 = vmax.f32 %v196_v48, 0.0 }
 0x132   :  { %v272_v53 = vpack.c.bf16 %v258_v50, %v257_v49 }
 0x133   :  { %v553_v54 = vpop.f32.mrb[4].mxu0  ;;  %v271_v55 = vpack.c.bf16 %v256_v52, %v255_v51 }
 0x134   :  { %v217_v56 = vadd.f32 %v553_v54, %v481_v40  ;;  %v208_v57 = vpop.f32.mrb[5].mxu0 }
 0x135   :  { %v209_v58 = vadd.f32 %v481_v40, %v208_v57  ;;  %v554_v59 = vpop.f32.mrb[6].mxu0  ;;  %579 = vmatprep.mubr.bf16.mxu1 %v271_v55 }
 0x136   :  { %v220_v60 = vadd.f32 %v554_v59, %v481_v40  ;;  %v211_v61 = vpop.f32.mrb[7].mxu0  ;;  %580 = vmatmul.mubr.bf16.vlgmr.msra.gmra.mrb[0].mxu1 %v272_v53  ;;  %v261_v63 = vmax.f32 %v217_v56, 0.0 }
 0x137   :  { %v212_v62 = vadd.f32 %v481_v40, %v211_v61  ;;  %v259_v1 = vmax.f32 %v209_v58, 0.0 }
 0x138   :  { %v262_v0 = vmax.f32 %v220_v60, 0.0 }
 0x139   :  { %v260_v2 = vmax.f32 %v212_v62, 0.0 }
 0x13a   :  { %v274_v3 = vpack.c.bf16 %v262_v0, %v261_v63 }
 0x13b   :  { %v273_v4 = vpack.c.bf16 %v260_v2, %v259_v1  ;;  %v557_v5 = vpop.f32.mrb[8].mxu0 }
 0x13c   :  { %v233_v6 = vadd.f32 %v557_v5, %v481_v40  ;;  %v224_v7 = vpop.f32.mrb[9].mxu0 }
 0x13d   :  { %v225_v8 = vadd.f32 %v481_v40, %v224_v7  ;;  %v558_v9 = vpop.f32.mrb[10].mxu0  ;;  %583 = vmatprep.mubr.bf16.mxu1 %v273_v4 }
 0x13e   :  { %v236_v10 = vadd.f32 %v558_v9, %v481_v40  ;;  %v227_v11 = vpop.f32.mrb[11].mxu0  ;;  %584 = vmatmul.mubr.bf16.gmra.mrb[4].mxu1 %v274_v3  ;;  %v265_v13 = vmax.f32 %v233_v6, 0.0 }
 0x13f   :  { %v228_v12 = vadd.f32 %v481_v40, %v227_v11  ;;  %v263_v15 = vmax.f32 %v225_v8, 0.0 }
 0x140   :  { %v266_v14 = vmax.f32 %v236_v10, 0.0 }
 0x141   :  { %v264_v16 = vmax.f32 %v228_v12, 0.0 }
 0x142   :  { %v276_v17 = vpack.c.bf16 %v266_v14, %v265_v13 }
 0x143   :  { %v275_v18 = vpack.c.bf16 %v264_v16, %v263_v15  ;;  %v561_v19 = vpop.f32.mrb[12].mxu0 }
 0x144   :  { %v249_v20 = vadd.f32 %v561_v19, %v481_v40  ;;  %v240_v21 = vpop.f32.mrb[13].mxu0 }
 0x145   :  { %v241_v22 = vadd.f32 %v481_v40, %v240_v21  ;;  %v562_v23 = vpop.f32.mrb[14].mxu0  ;;  %587 = vmatprep.mubr.bf16.mxu1 %v275_v18 }
 0x146   :  { %v252_v24 = vadd.f32 %v562_v23, %v481_v40  ;;  %v243_v25 = vpop.f32.mrb[15].mxu0  ;;  %588 = vmatmul.mubr.bf16.gmra.mrb[8].mxu1 %v276_v17  ;;  %v269_v27 = vmax.f32 %v249_v20, 0.0 }
 0x147   :  { %v244_v26 = vadd.f32 %v481_v40, %v243_v25  ;;  %v267_v29 = vmax.f32 %v241_v22, 0.0 }
 0x148   :  { %v270_v28 = vmax.f32 %v252_v24, 0.0 }
 0x149   :  { %v268_v30 = vmax.f32 %v244_v26, 0.0 }
 0x14a   :  { %v278_v31 = vpack.c.bf16 %v270_v28, %v269_v27 }
 0x14b   :  { %v277_v32 = vpack.c.bf16 %v268_v30, %v267_v29 }
 0x14d   :  { %591 = vmatprep.mubr.bf16.mxu1 %v277_v32 }
 0x14e   :  { %592 = vmatmul.mubr.bf16.gmra.mrb[12].mxu1 %v278_v31 }
 0x209   :  { %v581_v34 = vpop.f32.mrb[0].mxu1 }
 0x20a   :  { %v393_v35 = vadd.f32 %v581_v34, %v490_v33  ;;  %v384_v36 = vpop.f32.mrb[1].mxu1 }
 0x20b   :  { %v385_v37 = vadd.f32 %v490_v33, %v384_v36  ;;  %v582_v38 = vpop.f32.mrb[2].mxu1 }
 0x20c   :  { %449 = vst [vmem:[#allocation8 + $0x10] sm:$0xff] %v393_v35  ;;  %v396_v39 = vadd.f32 %v582_v38, %v490_v33  ;;  %v387_v40 = vpop.f32.mrb[3].mxu1 }
 0x20d   :  { %447 = vst [vmem:[#allocation8] sm:$0xff] %v385_v37  ;;  %v388_v41 = vadd.f32 %v490_v33, %v387_v40 }
 0x20e   :  { %450 = vst [vmem:[#allocation8 + $0x18] sm:$0xff] %v396_v39 }
 0x20f   :  { %448 = vst [vmem:[#allocation8 + $0x8] sm:$0xff] %v388_v41 }
 0x211   :  { %v585_v42 = vpop.f32.mrb[4].mxu1 }
 0x212   :  { %v409_v43 = vadd.f32 %v585_v42, %v490_v33  ;;  %v400_v44 = vpop.f32.mrb[5].mxu1 }
 0x213   :  { %v401_v45 = vadd.f32 %v490_v33, %v400_v44  ;;  %v586_v46 = vpop.f32.mrb[6].mxu1 }
 0x214   :  { %453 = vst [vmem:[#allocation8 + $0x30] sm:$0xff] %v409_v43  ;;  %v412_v47 = vadd.f32 %v586_v46, %v490_v33  ;;  %v403_v48 = vpop.f32.mrb[7].mxu1 }
 0x215   :  { %451 = vst [vmem:[#allocation8 + $0x20] sm:$0xff] %v401_v45  ;;  %v404_v49 = vadd.f32 %v490_v33, %v403_v48 }
 0x216   :  { %454 = vst [vmem:[#allocation8 + $0x38] sm:$0xff] %v412_v47 }
 0x217   :  { %452 = vst [vmem:[#allocation8 + $0x28] sm:$0xff] %v404_v49 }
 0x219   :  { %v589_v50 = vpop.f32.mrb[8].mxu1 }
 0x21a   :  { %v425_v51 = vadd.f32 %v589_v50, %v490_v33  ;;  %v416_v52 = vpop.f32.mrb[9].mxu1 }
 0x21b   :  { %v417_v53 = vadd.f32 %v490_v33, %v416_v52  ;;  %v590_v54 = vpop.f32.mrb[10].mxu1 }
 0x21c   :  { %457 = vst [vmem:[#allocation8 + $0x50] sm:$0xff] %v425_v51  ;;  %v428_v55 = vadd.f32 %v590_v54, %v490_v33  ;;  %v419_v56 = vpop.f32.mrb[11].mxu1 }
 0x21d   :  { %455 = vst [vmem:[#allocation8 + $0x40] sm:$0xff] %v417_v53  ;;  %v420_v57 = vadd.f32 %v490_v33, %v419_v56 }
 0x21e   :  { %458 = vst [vmem:[#allocation8 + $0x58] sm:$0xff] %v428_v55 }
 0x21f   :  { %456 = vst [vmem:[#allocation8 + $0x48] sm:$0xff] %v420_v57 }
 0x221   :  { %v593_v58 = vpop.f32.mrb[12].mxu1 }
 0x222   :  { %v441_v59 = vadd.f32 %v593_v58, %v490_v33  ;;  %v432_v60 = vpop.f32.mrb[13].mxu1 }
 0x223   :  { %v433_v61 = vadd.f32 %v490_v33, %v432_v60  ;;  %v594_v62 = vpop.f32.mrb[14].mxu1 }
 0x224   :  { %461 = vst [vmem:[#allocation8 + $0x70] sm:$0xff] %v441_v59  ;;  %v444_v63 = vadd.f32 %v594_v62, %v490_v33  ;;  %v435_v0 = vpop.f32.mrb[15].mxu1 }
 0x225   :  { %459 = vst [vmem:[#allocation8 + $0x60] sm:$0xff] %v433_v61  ;;  %v436_v1 = vadd.f32 %v490_v33, %v435_v0 }
 0x226   :  { %462 = vst [vmem:[#allocation8 + $0x78] sm:$0xff] %v444_v63 }
 0x227   :  { %460 = vst [vmem:[#allocation8 + $0x68] sm:$0xff] %v436_v1 }
 0x228   :  { %696 = shalt.err (!%p693_p0)
}
 0x229   :  { %s697_s12 = scalar_lea.hbm %s822_s5, 2048 }
 0x22a   :  { %p698_p1 = scmp.ne.s32.totalorder %s822_s5, %s697_s12  ;;  %p701_p2 = scmp.lt.u32.totalorder %s697_s12, %s822_s5 }
 0x22c   :  { %p703_p3 = pnand %p701_p2, %p698_p1 }
 0x22e   :  { %706 = shalt.err (!%p703_p3)
}
 0x22f   :  { %474 = dma.vmem_to_hbm [thread:$0]  %s469_s8, 2048, %s822_s5, [#allocation4], %s717_s1, %s717_s1, %s718_s17  }
 0x230   :  { %711 = dma.done.wait [#allocation4], 2048  }
 0x231   :  { %712 = vsyncadd [#allocation4], 4294965248 }
 0x232   :  { %478 = vsyncpa [#allocation3], 1 }
 0x233   :  { %479 = vsyncpa [#allocation6], 1 }
 0x234   :  { %480 = vsyncpa [#allocation4], 1 }

</bundles_post_ra>
